<compile_context>
chip_gen: v6e
topology: v6e:2x2x1
jax: 0.10.0
libtpu: 0.0.40
codegen_flags: <defaults>
</compile_context>

<pallas_src>
import functools

import jax
import jax.numpy as jnp
from jax.experimental import pallas as pl
from jax.experimental.pallas import tpu as pltpu


# ----------------------------------------------------------------------------- kernels


def _conv_block(x_ref, w_ref, m_ref, *, K, dilation, pad_l, pad_r):
    """Bias-free dilated conv along W for one (sample, H-row-band) block.

    x_ref: (1, C_in, RW) f32     RW = h_tile * W, whole H-rows flattened onto lanes
    w_ref: (C_out, K*C_in) bf16  row index = k*C_in + ci
    m_ref: (K+1, RW) f32         rows 0..K-1: per-tap row-boundary masks (0/1),
                                 row K:       valid-output-position mask (w < W_out)
    returns (acc (C_out, RW) f32, m (K+1, RW) f32)
    """
    x = x_ref[0]                                       # (C_in, RW) f32
    m = m_ref[...]                                     # (K+1, RW) f32
    rw = x.shape[1]

    # In-kernel zero pad of the flattened lane axis (cheap lane shifts, no HBM pass).
    xp = jnp.pad(x, ((0, 0), (pad_l, pad_r)))          # (C_in, RW + (K-1)*d)

    # Build the lane-dense im2col operand: K statically-shifted, boundary-masked windows
    # stacked along the contraction axis -> ONE fused K*C_in-deep matmul (review: fuse taps).
    cols = []
    for k in range(K):                                 # static tap loop
        win = xp[:, k * dilation: k * dilation + rw] * m[k:k + 1, :]   # f32 VPU work
        cols.append(win.astype(jnp.bfloat16))          # bf16 only as MXU operand
    xcol = jnp.concatenate(cols, axis=0)               # (K*C_in, RW) bf16

    acc = jax.lax.dot_general(                         # (C_out, RW) f32 accumulate
        w_ref[...], xcol, (((1,), (0,)), ((), ())),
        preferred_element_type=jnp.float32)
    return acc, m


def _conv_stats_kernel(x_ref, w_ref, m_ref, stats_ref, *, K, dilation, pad_l, pad_r):
    """Pass 1: per-tile per-channel (sum, sum-of-squares) of the bias-free conv output."""
    acc, m = _conv_block(x_ref, w_ref, m_ref,
                         K=K, dilation=dilation, pad_l=pad_l, pad_r=pad_r)
    valid = m[K:K + 1, :]                              # (1, RW) f32, 0/1
    accv = acc * valid
    s = jnp.sum(accv, axis=1, keepdims=True)           # (C_out, 1)
    sq = jnp.sum(accv * accv, axis=1, keepdims=True)   # (C_out, 1)
    st = jnp.concatenate([s, sq], axis=1)              # (C_out, 2)
    stats_ref[...] = st[None, None, :, :]


def _conv_bn_relu_kernel(x_ref, w_ref, m_ref, scale_ref, shift_ref, o_ref,
                         *, K, dilation, pad_l, pad_r):
    """Pass 2: recompute conv, apply folded BatchNorm (scale/shift) + ReLU, store NCHW-major."""
    acc, _ = _conv_block(x_ref, w_ref, m_ref,
                         K=K, dilation=dilation, pad_l=pad_l, pad_r=pad_r)
    y = acc * scale_ref[...] + shift_ref[...]          # (C_out, RW), per-channel affine
    o_ref[...] = jnp.maximum(y, 0.0).astype(o_ref.dtype)[None, :, :]


# ----------------------------------------------------------------------------- wrapper


def _scoped_vmem_limit_bytes():
    """Per-generation VMEM budget: half of physical VMEM, capped at 64 MiB.
    v5e/v6e (128 MiB physical) -> 64 MiB, v7x (64 MiB physical) -> 32 MiB."""
    cap = 64 * 1024 * 1024
    try:
        info = pltpu.get_tpu_info()
        cap = int(getattr(info, "vmem_capacity_bytes", cap)) or cap
    except Exception:
        pass
    return int(min(max(cap // 2, 16 * 1024 * 1024), 64 * 1024 * 1024))


def _tile_vmem_bytes(h, W, C_in, C_out, K):
    """Rough VMEM estimate per grid step: double-buffered in/out blocks + kernel temps."""
    rw = h * W
    dbuf = 2 * rw * 4 * (C_in + C_out)                  # f32 input + output blocks (x2 buffers)
    mask = 2 * rw * 4 * (K + 1)                         # mask block
    tmp = rw * 4 * (2 * C_in + C_out) + rw * 2 * K * C_in  # padded x / windows, acc f32, im2col bf16
    return dbuf + mask + tmp


def _pick_h_tile(H, W, C_in, C_out, K, budget):
    """Largest divisor of H whose block is layout-legal ((h*W) % 128 == 0 or h == H)
    and fits the VMEM budget; falls back to the smallest legal divisor."""
    legal = [h for h in range(1, H + 1)
             if H % h == 0 and ((h * W) % 128 == 0 or h == H)]
    fitting = [h for h in legal if _tile_vmem_bytes(h, W, C_in, C_out, K) <= budget]
    return max(fitting) if fitting else min(legal)


def tcn_layer_forward(x, weight, bias, gamma, beta, *, kernel_size, dilation=1, eps=1e-5):
    """x: (N, C_in, H, W) NCHW f32, weight: (C_out, C_in, 1, K), bias/gamma/beta: (C_out,).
    Returns (N, C_out, H, W_out) f32 — PyTorch TCNLayer forward (train-mode BatchNorm)."""
    N, C_in, H, W = x.shape
    C_out = weight.shape[0]
    K = kernel_size
    pad_l = (K - 1) * dilation // 2                     # PyTorch Conv2d padding (floor)
    pad_r = (K - 1) * dilation - pad_l
    W_out = W + 2 * pad_l - dilation * (K - 1)

    # `bias` is exactly cancelled by train-mode BatchNorm (mean subtraction); folded out.
    # TODO(synk): BatchNorm2d running_mean/running_var buffer updates (training side
    # effect, not part of the returned tensor) are not emulated.

    x3 = x.reshape(N, C_in, H * W)                      # metadata-only reshape (stays NCHW)

    # Conv weight (C_out, C_in, 1, K) -> (C_out, K*C_in) bf16, row index = k*C_in + ci.
    w2 = jnp.transpose(weight[:, :, 0, :], (0, 2, 1)).reshape(C_out, K * C_in)
    w2 = w2.astype(jnp.bfloat16)

    vmem_limit = _scoped_vmem_limit_bytes()
    h_tile = _pick_h_tile(H, W, C_in, C_out, K, budget=vmem_limit // 2)
    HB = H // h_tile
    RW = h_tile * W

    # Precomputed 0/1 masks (tiny, identical for every tile):
    #   rows 0..K-1: zero taps that would cross an H-row boundary of the flattened block
    #   row  K     : valid output positions (w < W_out)
    w_idx = jnp.arange(RW, dtype=jnp.int32) % W
    rows = [((w_idx + (k * dilation - pad_l)) >= 0)
            & ((w_idx + (k * dilation - pad_l)) < W) for k in range(K)]
    rows.append(w_idx < W_out)
    masks = jnp.stack(rows, axis=0).astype(jnp.float32)  # (K+1, RW)

    grid = (N, HB)
    cparams = pltpu.CompilerParams(
        dimension_semantics=("parallel", "parallel"),    # both TCs usable on v7x
        vmem_limit_bytes=vmem_limit)

    x_spec = pl.BlockSpec((1, C_in, RW), lambda n, hb: (n, 0, hb))
    w_spec = pl.BlockSpec((C_out, K * C_in), lambda n, hb: (0, 0))
    m_spec = pl.BlockSpec((K + 1, RW), lambda n, hb: (0, 0))
    conv_kw = dict(K=K, dilation=dilation, pad_l=pad_l, pad_r=pad_r)

    # Pass 1: conv -> per-tile per-channel (sum, sum_sq).  No large intermediate in HBM.
    stats = pl.pallas_call(
        functools.partial(_conv_stats_kernel, **conv_kw),
        grid=grid,
        in_specs=[x_spec, w_spec, m_spec],
        out_specs=pl.BlockSpec((1, 1, C_out, 2), lambda n, hb: (n, hb, 0, 0)),
        out_shape=jax.ShapeDtypeStruct((N, HB, C_out, 2), jnp.float32),
        compiler_params=cparams,
    )(x3, w2, masks)

    # Fold train-mode BatchNorm into a per-channel scale/shift (conv bias cancels exactly).
    tot = jnp.sum(stats, axis=(0, 1))                    # (C_out, 2) — tiny JAX reduction
    count = float(N * H * W_out)
    mean = tot[:, 0] / count
    var = tot[:, 1] / count - mean * mean                # biased batch variance (train-mode BN)
    scale = gamma.astype(jnp.float32) * jax.lax.rsqrt(var + eps)
    shift = beta.astype(jnp.float32) - mean * scale
    scale = scale.reshape(C_out, 1)
    shift = shift.reshape(C_out, 1)

    # Pass 2: recompute conv, apply scale/shift + ReLU, store straight into the NCHW-major
    # output (lane-dense (C_out, h_tile*W) stores, no final transpose pass).
    out3 = pl.pallas_call(
        functools.partial(_conv_bn_relu_kernel, **conv_kw),
        grid=grid,
        in_specs=[x_spec, w_spec, m_spec,
                  pl.BlockSpec((C_out, 1), lambda n, hb: (0, 0)),
                  pl.BlockSpec((C_out, 1), lambda n, hb: (0, 0))],
        out_specs=pl.BlockSpec((1, C_out, RW), lambda n, hb: (n, 0, hb)),
        out_shape=jax.ShapeDtypeStruct((N, C_out, H * W), jnp.float32),
        compiler_params=cparams,
    )(x3, w2, masks, scale, shift)

    out = out3.reshape(N, C_out, H, W)
    if W_out < W:                                        # only when (K-1)*dilation is odd
        out = out[..., :W_out]
    return out


# ----------------------------------------------------------------------------- reference


def tcn_layer_ref(x, weight, bias, gamma, beta, kernel_size, dilation, eps=1e-5):
    """Pure-JAX reference matching PyTorch TCNLayer forward (train-mode BatchNorm)."""
    pad = (kernel_size - 1) * dilation // 2
    y = jax.lax.conv_general_dilated(
        x, weight, window_strides=(1, 1), padding=((0, 0), (pad, pad)),
        rhs_dilation=(1, dilation),
        dimension_numbers=("NCHW", "OIHW", "NCHW"))
    y = y + bias.reshape(1, -1, 1, 1)
    mean = y.mean(axis=(0, 2, 3), keepdims=True)
    var = ((y - mean) ** 2).mean(axis=(0, 2, 3), keepdims=True)
    yn = (y - mean) / jnp.sqrt(var + eps)
    yn = yn * gamma.reshape(1, -1, 1, 1) + beta.reshape(1, -1, 1, 1)
    return jnp.maximum(yn, 0.0)


if __name__ == "__main__":
    key = jax.random.PRNGKey(0)
    N, C_in, H, W = 2, 4, 16, 16
    C_out, K, DIL = 8, 3, 1

    k1, k2, k3 = jax.random.split(key, 3)
    x = jax.random.normal(k1, (N, C_in, H, W), jnp.float32)

    # PyTorch-style uniform conv init; BatchNorm2d default affine params.
    fan_in = C_in * 1 * K
    bound = 1.0 / (fan_in ** 0.5)
    weight = jax.random.uniform(k2, (C_out, C_in, 1, K), jnp.float32, -bound, bound)
    bias = jax.random.uniform(k3, (C_out,), jnp.float32, -bound, bound)
    gamma = jnp.ones((C_out,), jnp.float32)
    beta = jnp.zeros((C_out,), jnp.float32)

    out = tcn_layer_forward(x, weight, bias, gamma, beta, kernel_size=K, dilation=DIL)
    out = jax.block_until_ready(out)

    # Strict check: reference fed the same bf16-rounded conv operands as the kernel's MXU path.
    xb = x.astype(jnp.bfloat16).astype(jnp.float32)
    wb = weight.astype(jnp.bfloat16).astype(jnp.float32)
    ref_strict = tcn_layer_ref(xb, wb, bias, gamma, beta, K, DIL)
    assert out.shape == ref_strict.shape, (out.shape, ref_strict.shape)
    assert jnp.allclose(out, ref_strict, atol=2e-3, rtol=2e-3), \
        float(jnp.max(jnp.abs(out - ref_strict)))

    # Loose check against the full-f32 PyTorch-equivalent reference (bf16 MXU operands).
    ref_f32 = tcn_layer_ref(x, weight, bias, gamma, beta, K, DIL)
    assert jnp.allclose(out, ref_f32, atol=7.5e-2, rtol=5e-2), \
        float(jnp.max(jnp.abs(out - ref_f32)))

    print("KERNEL_OK")
</pallas_src>

<mosaic_0001>
module attributes {stable_mosaic.version = 11 : i64} {
  func.func @_conv_stats_kernel(%arg0: i32, %arg1: i32, %arg2: memref<1x4x256xf32, #tpu.memory_space<vmem>>, %arg3: memref<8x12xbf16, #tpu.memory_space<vmem>>, %arg4: memref<4x256xf32, #tpu.memory_space<vmem>>, %arg5: memref<1x1x8x2xf32, #tpu.memory_space<vmem>>) attributes {dimension_semantics = [#tpu.dimension_semantics<parallel>, #tpu.dimension_semantics<parallel>], iteration_bounds = array<i64: 2, 1>, scalar_prefetch = 0 : i64, scratch_operands = 0 : i64, tpu.core_type = #tpu.core_type<tc>, window_params = [{transform_indices = @transform_0, window_bounds = array<i64: 1, 4, 256>}, {pipeline_mode = #tpu.pipeline_mode<synchronous>, transform_indices = @transform_1, window_bounds = array<i64: 8, 12>}, {pipeline_mode = #tpu.pipeline_mode<synchronous>, transform_indices = @transform_2, window_bounds = array<i64: 4, 256>}, {transform_indices = @transform_3, window_bounds = array<i64: 1, 1, 8, 2>}]} {
    %c0 = arith.constant 0 : index
    %c0_0 = arith.constant 0 : index
    %c0_1 = arith.constant 0 : index
    %0 = vector.load %arg2[%c0, %c0_0, %c0_1] : memref<1x4x256xf32, #tpu.memory_space<vmem>>, vector<1x4x256xf32>
    %1 = vector.shape_cast %0 : vector<1x4x256xf32> to vector<4x256xf32>
    %c0_2 = arith.constant 0 : index
    %c0_3 = arith.constant 0 : index
    %2 = vector.load %arg4[%c0_2, %c0_3] : memref<4x256xf32, #tpu.memory_space<vmem>>, vector<4x256xf32>
    %c0_i32 = arith.constant 0 : i32
    %3 = arith.sitofp %c0_i32 : i32 to f32
    %4 = vector.broadcast %3 : f32 to vector<4x1xf32>
    %5 = tpu.concatenate %4, %1 in 1 : vector<4x1xf32>, vector<4x256xf32> -> vector<4x257xf32>
    %6 = vector.broadcast %3 : f32 to vector<4x1xf32>
    %7 = tpu.concatenate %5, %6 in 1 : vector<4x257xf32>, vector<4x1xf32> -> vector<4x258xf32>
    %8 = vector.extract_strided_slice %7 {offsets = [0, 0], sizes = [4, 256], strides = [1, 1]} : vector<4x258xf32> to vector<4x256xf32>
    %9 = vector.extract_strided_slice %2 {offsets = [0, 0], sizes = [1, 256], strides = [1, 1]} : vector<4x256xf32> to vector<1x256xf32>
    %10 = vector.broadcast %9 : vector<1x256xf32> to vector<4x256xf32>
    %11 = arith.mulf %8, %10 : vector<4x256xf32>
    %12 = arith.truncf %11 : vector<4x256xf32> to vector<4x256xbf16>
    %13 = vector.extract_strided_slice %7 {offsets = [0, 1], sizes = [4, 256], strides = [1, 1]} : vector<4x258xf32> to vector<4x256xf32>
    %14 = vector.extract_strided_slice %2 {offsets = [1, 0], sizes = [1, 256], strides = [1, 1]} : vector<4x256xf32> to vector<1x256xf32>
    %15 = vector.broadcast %14 : vector<1x256xf32> to vector<4x256xf32>
    %16 = arith.mulf %13, %15 : vector<4x256xf32>
    %17 = arith.truncf %16 : vector<4x256xf32> to vector<4x256xbf16>
    %18 = vector.extract_strided_slice %7 {offsets = [0, 2], sizes = [4, 256], strides = [1, 1]} : vector<4x258xf32> to vector<4x256xf32>
    %19 = vector.extract_strided_slice %2 {offsets = [2, 0], sizes = [1, 256], strides = [1, 1]} : vector<4x256xf32> to vector<1x256xf32>
    %20 = vector.broadcast %19 : vector<1x256xf32> to vector<4x256xf32>
    %21 = arith.mulf %18, %20 : vector<4x256xf32>
    %22 = arith.truncf %21 : vector<4x256xf32> to vector<4x256xbf16>
    %23 = tpu.concatenate %12, %17, %22 in 0 : vector<4x256xbf16>, vector<4x256xbf16>, vector<4x256xbf16> -> vector<12x256xbf16>
    %c0_4 = arith.constant 0 : index
    %c0_5 = arith.constant 0 : index
    %24 = vector.load %arg3[%c0_4, %c0_5] : memref<8x12xbf16, #tpu.memory_space<vmem>>, vector<8x12xbf16>
    %cst = arith.constant dense<0.000000e+00> : vector<8x256xf32>
    %25 = tpu.matmul %24, %23, %cst {dimension_numbers = #tpu.dot_dimension_numbers<[1], [0], [0], [1], [0, 0, 1, 1], [], []>} : vector<8x12xbf16>, vector<12x256xbf16>, vector<8x256xf32> -> vector<8x256xf32>
    %26 = vector.extract_strided_slice %2 {offsets = [3, 0], sizes = [1, 256], strides = [1, 1]} : vector<4x256xf32> to vector<1x256xf32>
    %27 = vector.broadcast %26 : vector<1x256xf32> to vector<8x256xf32>
    %28 = arith.mulf %25, %27 : vector<8x256xf32>
    %cst_6 = arith.constant dense<0.000000e+00> : vector<8xf32>
    %29 = vector.multi_reduction <add>, %28, %cst_6 [1] : vector<8x256xf32> to vector<8xf32>
    %30 = vector.shape_cast %29 : vector<8xf32> to vector<8x1xf32>
    %31 = arith.mulf %28, %28 : vector<8x256xf32>
    %cst_7 = arith.constant dense<0.000000e+00> : vector<8xf32>
    %32 = vector.multi_reduction <add>, %31, %cst_7 [1] : vector<8x256xf32> to vector<8xf32>
    %33 = vector.shape_cast %32 : vector<8xf32> to vector<8x1xf32>
    %34 = tpu.concatenate %30, %33 in 1 : vector<8x1xf32>, vector<8x1xf32> -> vector<8x2xf32>
    %35 = vector.shape_cast %34 : vector<8x2xf32> to vector<1x1x8x2xf32>
    %c0_8 = arith.constant 0 : index
    %c0_9 = arith.constant 0 : index
    %c0_10 = arith.constant 0 : index
    %c0_11 = arith.constant 0 : index
    %36 = vector.load %arg5[%c0_8, %c0_9, %c0_10, %c0_11] : memref<1x1x8x2xf32, #tpu.memory_space<vmem>>, vector<1x1x8x2xf32>
    tpu.vector_store %arg5[%c0_8, %c0_9, %c0_10, %c0_11], %35 {strides = array<i32>} : memref<1x1x8x2xf32, #tpu.memory_space<vmem>>, vector<1x1x8x2xf32>,
    return
  }
  func.func @transform_0(%arg0: i32, %arg1: i32) -> (i32, i32, i32) {
    %c0_i32 = arith.constant 0 : i32
    %c0_i32_0 = arith.constant 0 : i32
    return %arg0, %c0_i32, %arg1 : i32, i32, i32
  }
  func.func @transform_1(%arg0: i32, %arg1: i32) -> (i32, i32) {
    %c0_i32 = arith.constant 0 : i32
    %c0_i32_0 = arith.constant 0 : i32
    %c0_i32_1 = arith.constant 0 : i32
    return %c0_i32, %c0_i32_0 : i32, i32
  }
  func.func @transform_2(%arg0: i32, %arg1: i32) -> (i32, i32) {
    %c0_i32 = arith.constant 0 : i32
    %c0_i32_0 = arith.constant 0 : i32
    %c0_i32_1 = arith.constant 0 : i32
    return %c0_i32, %c0_i32_0 : i32, i32
  }
  func.func @transform_3(%arg0: i32, %arg1: i32) -> (i32, i32, i32, i32) {
    %c0_i32 = arith.constant 0 : i32
    %c0_i32_0 = arith.constant 0 : i32
    %c0_i32_1 = arith.constant 0 : i32
    return %arg0, %arg1, %c0_i32, %c0_i32_0 : i32, i32, i32, i32
  }
}

</mosaic_0001>

<bundles_post_ra>
// kernel: tpu_custom_call.1
= control target key start
LH: loop header
LB: loop body
LE: loop exit
PB: predicated region body
PF: predicated region fallthrough
CT: control target
= control target key end

     0   :  { %8 = vsyncpa [#allocation3], 0  ;;  %s999_s0 = inlined_call_operand.hbm [shape: f32[2,4,256], index: 0, kind: input, shape index: {}]   ;;  %s1000_s1 = inlined_call_operand.hbm [shape: bf16[8,12], index: 1, kind: input, shape index: {}]   ;;  %s1001_s2 = inlined_call_operand.hbm [shape: f32[4,256], index: 2, kind: input, shape index: {}]   ;;  %s1002_s3 = inlined_call_operand.vmem [shape: f32[2,1,8,2], index: 3, kind: output, shape index: {}]  }
   0x1   :  { %10 = vsyncpa [#allocation3 + $0x1], 0 }
   0x2   :  { %11 = vsyncpa [#allocation5], 0  ;;  %s838_s12 = smov 0   ;;  %s840_s13 = smov 0  }
   0x3   :  { %s842_s14 = smov 0   ;;  %s844_s15 = smov 0  }
   0x4   :  { %s846_s16 = smov 0   ;;  %s848_s17 = smov 0  }
   0x5 LB: > { %s573_s18 = sadd.s32 4294967295, %s808_s17   ;;  %p51_p0 = scmp.ne.s32.totalorder %s792_s13, %s788_s12  ;;  %s808_s17 = sphi %s848_s17, %s17_s17   ;;  %s804_s16 = sphi %s846_s16, %s1020_s16   ;;  %s800_s15 = sphi %s844_s15, %s1019_s15   ;;  %s796_s14 = sphi %s842_s14, %s1018_s14   ;;  %s792_s13 = sphi %s840_s13, %s1017_s13   ;;  %s788_s12 = sphi %s838_s12, %s1016_s12  }
   0x6   : > { %p868_p1 = scmp.eq.s32.totalorder %s573_s18, 0  ;;  %p575_p2 = scmp.ge.s32.totalorder %s808_s17, 1 }
   0x7   : > { %p132_p3 = scmp.lt.s32.totalorder %s808_s17, 3  ;;  %s810_s22 = smov [#allocation4]  }
   0x8   : > { %s1007_s19 = scalar_select %p868_p1, 1, 0 }
   0x9   : > { %p876_p4 = por %p868_p1, %p51_p0  ;;  %p880_p5 = pnand %p575_p2, %p132_p3 }
   0xa   : > { %s145_s23 = sshll.u32 %s810_s22, 4  ;;  %s811_s24 = smov [#allocation6]   ;;  %s146_s23 = int_to_ptr.vmem [resolvable:$true] %s145_s23 }
   0xb   : > { %s1008_s20 = scalar_select %p876_p4, 1, 0 }
   0xc   : > { %s1009_s21 = scalar_select %p880_p5, 1, 0 }
   0xd   : > { %p602_p6 = pneg %p880_p5  ;;  %s156_s25 = sshll.u32 %s811_s24, 4  ;;  %s157_s25 = int_to_ptr.vmem [resolvable:$true] %s156_s25 }
   0xe   : > { %s685_s27 = scalar_lea.vmem %s146_s23, 64  ;;  %p693_p12 = scmp.lt.s32.totalorder %s146_s23, %s146_s23 }
   0xf   : > { %p888_p7 = pnand %p602_p6, %p868_p1  ;;  %p686_p9 = scmp.ne.s32.totalorder %s146_s23, %s685_s27 }
  0x10   : > { %p694_p13 = scmp.lt.s32.totalorder %s685_s27, %s685_s27 }
  0x11   : > { %p676_p8 = pneg %p888_p7 }
  0x12   : > { %p695_p0 = por %p694_p13, %p693_p12 }
  0x13   : > { %p688_p10 = pnand %p686_p9, %p676_p8 }
  0x15   : > { %p689_p11 = pneg %p688_p10 }
  0x17   : > { %p696_p2 = pnand %p695_p0, %p689_p11 }
  0x19   : > { %699 = shalt.err (!%p696_p2)
}
  0x1a   : > { %605 = dma.hbm_to_vmem [thread:$0]  (!%p888_p7), %s1000_s1, 64, %s146_s23, [#allocation5]  }
  0x1b   : > { %s711_s30 = scalar_lea.vmem %s157_s25, 128  ;;  %p719_p9 = scmp.lt.s32.totalorder %s157_s25, %s157_s25 }
  0x1c   : > { %p712_p3 = scmp.ne.s32.totalorder %s157_s25, %s711_s30  ;;  %p720_p10 = scmp.lt.s32.totalorder %s711_s30, %s711_s30 }
  0x1e   : > { %p714_p6 = pnand %p712_p3, %p676_p8  ;;  %p721_p4 = por %p720_p10, %p719_p9 }
  0x20   : > { %p715_p1 = pneg %p714_p6 }
  0x22   : > { %p722_p5 = pnand %p721_p4, %p715_p1 }
  0x24   : > { %725 = shalt.err (!%p722_p5)
}
  0x25   : > { %608 = dma.hbm_to_vmem [thread:$0]  (!%p888_p7), %s1001_s2, 128, %s157_s25, [#allocation5]  }
  0x26   : > { %s29_s6 = sadd.s32 1, %s804_s16  ;;  %s38_s7 = sadd.s32 1, %s796_s14 }
  0x27   : > { %p31_p1 = scmp.ge.s32.totalorder %s29_s6, 2  ;;  %p45_p4 = scmp.ne.s32.totalorder %s796_s14, %s792_s13 }
  0x28   : > { %p46_p5 = scmp.eq.s32.totalorder %s808_s17, 0  ;;  %p615_p8 = scmp.lt.s32.totalorder %s808_s17, 2 }
  0x29   : > { %s1022_s6 = smov (%p31_p1, %s29_s6), 0  ;;  %s167_s8 = sand.u32 1, %s796_s14  }
  0x2a   : > { %p47_p11 = por %p46_p5, %p45_p4  ;;  %s33_s9 = ssub.s32 %s804_s16, %s1022_s6 }
  0x2b   : > { %p36_p12 = scmp.eq.s32.totalorder %s33_s9, 0  ;;  %s579_s10 = sshll.u32 %s167_s8, 3 }
  0x2c   : > { %s591_s11 = sshll.u32 %s804_s16, 7  ;;  %s171_s24 = scalar_lea.vmem [#allocation2], %s579_s10 }
  0x2d   : > { %s923_s12 = scalar_select %p36_p12, %s796_s14, %s38_s7  }
  0x2e   : > { %s179_s23 = scalar_lea.hbm %s999_s0, %s591_s11  ;;  %s181_s25 = sshll.u32 %s171_s24, 4  ;;  %s182_s25 = int_to_ptr.vmem [resolvable:$true] %s181_s25 }
  0x2f   : > { %p930_p7 = pnand %p615_p8, %p47_p11  ;;  %s168_s27 = scalar_lea.sflag [#allocation3], %s167_s8 }
  0x30   : > { %s739_s28 = scalar_lea.vmem %s182_s25, 128  ;;  %s812_s29 = smov [#allocation2]  }
  0x31   : > { %p728_p13 = pneg %p930_p7  ;;  %p740_p0 = scmp.ne.s32.totalorder %s182_s25, %s739_s28 }
  0x32   : > { %s744_s30 = sshll.u32 %s812_s29, 4  ;;  %s745_s30 = int_to_ptr.vmem [resolvable:$false] %s744_s30 }
  0x33   : > { %p742_p2 = pnand %p740_p0, %p728_p13  ;;  %s746_s4 = scalar_lea.vmem %s745_s30, 256 }
  0x34   : > { %p747_p6 = scmp.lt.s32.totalorder %s182_s25, %s745_s30  ;;  %p748_p9 = scmp.lt.s32.totalorder %s746_s4, %s739_s28 }
  0x35   : > { %p743_p3 = pneg %p742_p2 }
  0x36   : > { %p749_p10 = por %p748_p9, %p747_p6 }
  0x38   : > { %p750_p1 = pnand %p749_p10, %p743_p3 }
  0x3a   : > { %753 = shalt.err (!%p750_p1)
}
  0x3b   : > { %612 = dma.hbm_to_vmem [thread:$0]  (!%p930_p7), %s179_s23, 128, %s182_s25, %s168_s27  }
  0x3c   : > { %p1012_p4 = scmp.ne.s32.totalorder %s1009_s21, 0 }
  0x3d   : > { %s192_s5 = sand.u32 (!%p1012_p4), 1, %s792_s13   ;;  %p1013_p5 = scmp.ne.s32.totalorder (!%p1012_p4), %s1008_s20, 0 }
  0x3e   : > { %190 = sbr.rel (%p1012_p4) target bundleno = 673 (0x2a1), region = 32  ;;  %s583_s7 = sshll.u32 (!%p1012_p4), %s192_s5, 3 }
  0x3f   : > { %s193_s8 = scalar_lea.sflag (!%p1012_p4), [#allocation3], %s192_s5  ;;  %s196_s9 = scalar_lea.vmem (!%p1012_p4), [#allocation2], %s583_s7 }
  0x43   : > { %779 = dma.done.wait (%p1013_p5), %s193_s8, 128  }
  0x44   : > { %781 = vsyncadd (%p1013_p5), %s193_s8, 4294967168  ;;  %p1014_p8 = scmp.ne.s32.totalorder %s1007_s19, 0 }
  0x46   : > { %783 = dma.done.wait (%p1014_p8), [#allocation5], 192  }
  0x47   : > { %785 = vsyncadd (%p1014_p8), [#allocation5], 4294967104  ;;  %v254_v0 = vlaneseq  ;;  %v238_v5 = vld [vmem:[%s196_s9] sm:$0xff]  ;;  %v954_v6 = vld [vmem:[#allocation6] sm:$0xff]  ;;  %s813_s20 = smov 1   ;;  %s814_s19 = smov 2  }
  0x48   : > { %242 = vrot.lane.b32.xlu0 %v238_v5, %s813_s20  ;;  %v241_v8 = vcombine.high %v238_v5, %v238_v5  ;;  %vm246_vm0 = vcmask 7168   ;;  %vm334_vm1 = vcmask 15360   ;;  %s815_s21 = smov 127   ;;  %s816_s10 = smov 126   ;;  %v817_v42 = vmov 0  }
  0x49   : > { %v949_v1 = vshrl.u32 %v254_v0, 7  ;;  %429 = vmatprep.mubr.bf16.mxu0 %v817_v42  ;;  %vm357_vm2 = vcmask 1039360   ;;  %vm372_vm3 = vcmask 1031168   ;;  %vm375_vm4 = vcmask 1041408   ;;  %p230_p11 = scmp.lt.s32.totalorder %s800_s15, 1 }
  0x4a   : > { %vm382_vm5 = vcmask 1043456   ;;  %vm392_vm6 = vcmask 1045504   ;;  %vm388_vm7 = vcmask 97280  }
  0x4b   : > { %v278_v2 = vsub.s32 1, %v949_v1  ;;  %v282_v3 = vsub.s32 5, %v949_v1  ;;  %v312_v4 = vsub.s32 2, %v949_v1  ;;  %v316_v7 = vsub.s32 6, %v949_v1  ;;  %s1024_s15 = smov (!%p230_p11, %s800_s15), 1 }
  0x4c   : > { %244 = vrot.lane.b32.xlu0 %v241_v8, %s813_s20  ;;  %v256_v47 = vsub.s32 0, %v949_v1  ;;  %v260_v48 = vsub.s32 4, %v949_v1  ;;  %s586_s11 = sshll.u32 %s1024_s15, 3 }
  0x4d   : > { %v279_v9 = vrot.slane %v954_v6, %v278_v2  ;;  %v283_v10 = vrot.slane %v954_v6, %v282_v3  ;;  %v313_v11 = vrot.slane %v954_v6, %v312_v4  ;;  %v317_v15 = vrot.slane %v954_v6, %v316_v7  ;;  %s236_s23 = scalar_lea.vmem %s1002_s3, %s586_s11 }
  0x4e   : > { %v257_v49 = vrot.slane %v954_v6, %v256_v47  ;;  %v261_v50 = vrot.slane %v954_v6, %v260_v48 }
  0x4f   : > { %v289_v12 = vrot.slane %v279_v9, %v278_v2  ;;  %v293_v13 = vrot.slane %v283_v10, %v278_v2  ;;  %v323_v14 = vrot.slane %v313_v11, %v312_v4  ;;  %v327_v16 = vrot.slane %v317_v15, %v312_v4  ;;  %v387_v10 = vld [vmem:[#allocation4] sm:$0xf] }
  0x50   : > { %v267_v51 = vrot.slane %v257_v49, %v256_v47  ;;  %v271_v53 = vrot.slane %v261_v50, %v256_v47  ;;  %v440_v11 = vsub.s32 3, %v949_v1 }
  0x51   : > { %296 = vrot.lane.b32.xlu1 %v289_v12, %s813_s20  ;;  %330 = vrot.lane.b32.xlu0 %v323_v14, %s814_s19  ;;  %v444_v12 = vsub.s32 7, %v949_v1 }
  0x53   : > { %v445_v14 = vrot.slane %v954_v6, %v444_v12 }
  0x55   : > { %298 = vrot.lane.b32.xlu1 %v293_v13, %s813_s20  ;;  %v441_v13 = vrot.slane %v954_v6, %v440_v11 }
  0x57   : > { %v451_v15 = vrot.slane %v441_v13, %v440_v11 }
  0x59   : > { %332 = vrot.lane.b32.xlu1 %v327_v16, %s814_s19  ;;  %v455_v16 = vrot.slane %v445_v14, %v440_v11 }
  0xba   : > { %v243_v17 = vpop.permute.xlu0 %242 }
  0xbb   : > { %v251_v18 = vsel %vm246_vm0, 0.0, %v243_v17 }
  0xbc   : > { %v272_v54 = vmul.f32 %v267_v51, %v251_v18 }
  0xbe   : > { %v245_v20 = vpop.permute.xlu0 %244  ;;  %v274_v58 = vpack.c.bf16 %v272_v54, %v272_v54 }
  0xbf   : > { %v247_v23 = vsel %vm246_vm0, %v243_v17, %v245_v20  ;;  %v252_v24 = vsel %vm246_vm0, %v245_v20, 0.0 }
  0xc0   : > { %v273_v57 = vmul.f32 %v271_v53, %v247_v23 }
  0xc2   : > { %v275_v2 = vpack.c.bf16 %v273_v57, %v273_v57 }
  0xc3   : > { %v297_v19 = vpop.permute.xlu1 %296  ;;  %v331_v26 = vpop.permute.xlu0 %330 }
  0xc4   : > { %v304_v21 = vmul.f32 %v297_v19, %v251_v18  ;;  %v339_v30 = vmul.f32 %v331_v26, %v251_v18 }
  0xc6   : > { %v307_v22 = vpack.c.bf16 %v304_v21, %v304_v21  ;;  %v342_v33 = vpack.c.bf16 %v339_v30, %v339_v30 }
  0xc7   : > { %v299_v25 = vpop.permute.xlu1 %298 }
  0xc8   : > { %v348_v27 = vrot.slane %v307_v22, 6  ;;  %v300_v28 = vsel %vm246_vm0, %v297_v19, %v299_v25  ;;  %v306_v29 = vmul.f32 %v299_v25, %v252_v24  ;;  %v363_v37 = vrot.slane %v342_v33, 4 }
  0xc9   : > { %v305_v31 = vmul.f32 %v300_v28, %v247_v23 }
  0xca   : > { %v309_v32 = vpack.c.bf16 %v306_v29, %v306_v29  ;;  %351 = vrot.lane.b32.xlu0 %v348_v27, %s815_s21  ;;  %366 = vrot.lane.b32.xlu1 %v363_v37, %s816_s10 }
  0xcb   : > { %v308_v34 = vpack.c.bf16 %v305_v31, %v305_v31  ;;  %v333_v35 = vpop.permute.xlu1 %332 }
  0xcc   : > { %v350_v36 = vrot.slane %v309_v32, 6  ;;  %v335_v38 = vsel %vm334_vm1, %v331_v26, %v333_v35  ;;  %v341_v39 = vmul.f32 %v333_v35, %v252_v24 }
  0xcd   : > { %v340_v40 = vmul.f32 %v335_v38, %v247_v23  ;;  %v349_v43 = vrot.slane %v308_v34, 6 }
  0xce   : > { %355 = vrot.lane.b32.xlu0 %v350_v36, %s815_s21  ;;  %v344_v44 = vpack.c.bf16 %v341_v39, %v341_v39 }
  0xcf   : > { %v343_v41 = vpack.c.bf16 %v340_v40, %v340_v40  ;;  %353 = vrot.lane.b32.xlu1 %v349_v43, %s815_s21 }
  0xd0   : > { %v365_v46 = vrot.slane %v344_v44, 4 }
  0xd1   : > { %v364_v45 = vrot.slane %v343_v41, 4 }
  0xd3   : > { %368 = vrot.lane.b32.xlu0 %v364_v45, %s816_s10  ;;  %370 = vrot.lane.b32.xlu1 %v365_v46, %s816_s10 }
 0x13c   : > { %v352_v52 = vpop.permute.xlu0 %351  ;;  %v367_v55 = vpop.permute.xlu1 %366 }
 0x140   : > { %v356_v56 = vpop.permute.xlu0 %355 }
 0x141   : > { %v354_v59 = vpop.permute.xlu1 %353 }
 0x142   : > { %v358_v60 = vsel %vm357_vm2, %v352_v52, %v354_v59  ;;  %v359_v62 = vsel %vm357_vm2, %v354_v59, %v356_v56 }
 0x143   : > { %v378_v0 = vsel %vm375_vm4, %v274_v58, %v358_v60  ;;  %v381_v7 = vsel %vm375_vm4, %v275_v2, %v359_v62 }
 0x145   : > { %v369_v61 = vpop.permute.xlu0 %368  ;;  %v371_v3 = vpop.permute.xlu1 %370 }
 0x146   : > { %v373_v63 = vsel %vm372_vm3, %v367_v55, %v369_v61  ;;  %v374_v5 = vsel %vm372_vm3, %v369_v61, %v371_v3 }
 0x147   : > { %v384_v4 = vsel %vm382_vm5, %v378_v0, %v373_v63  ;;  %v386_v8 = vsel %vm382_vm5, %v381_v7, %v374_v5 }
 0x148   : > { %587 = vmatprep.subr.msk.bf16.mxu0 %vm392_vm6, %v386_v8  ;;  %v393_v9 = vsel %vm392_vm6, %v384_v4, 0 }
 0x149   : > { %412 = vmatpush1.bf16.msra.mxu0 %v393_v9 }
 0x14c   : > { %588 = vmatmul.mubr.msk.bf16.vlgmr.msra.gmra.mxu0 %vm388_vm7, %v387_v10 }
 0x20c   : > { %v431_v17 = vpop.f32.mrf.mxu0 }
 0x20d   : > { %v456_v18 = vmul.f32 %v451_v15, %v431_v17 }
 0x20e   : > { %v433_v19 = vpop.f32.mrf.mxu0 }
 0x20f   : > { %v457_v20 = vmul.f32 %v455_v16, %v433_v19  ;;  %v461_v22 = vmul.f32 %v456_v18, %v456_v18 }
 0x210   : > { %v435_v21 = vpop.f32.mrf.mxu0 }
 0x211   : > { %v462_v23 = vmul.f32 %v457_v20, %v457_v20  ;;  %v458_v24 = vadd.f32 %v457_v20, %v456_v18 }
 0x212   : > { %v436_v25 = vpop.f32.mrf.mxu0 }
 0x213   : > { %459 = vadd.xlane.f32.xlu0 %v458_v24  ;;  %v463_v26 = vadd.f32 %v462_v23, %v461_v22 }
 0x215   : > { %464 = vadd.xlane.f32.xlu1 %v463_v26 }
 0x29c   : > { %v460_v1 = vpop.xlane.xlu0 %459 }
 0x29e   : > { %v465_v6 = vpop.xlane.xlu1 %464 }
 0x29f   : > { %v466_v27 = vsel %vm246_vm0, %v460_v1, %v465_v6 }
 0x2a0   : > { %467 = vst.msk [vmem:[%s236_s23] sm:$0xff] %vm334_vm1, %v466_v27 }
 0x2a1 PF: > { %s17_s17 = sadd.s32 1, %s808_s17   ;;  %s1015_s24 = smov %s923_s12 }
 0x2a2   : > { %p14_p12 = scmp.ge.s32.totalorder %s17_s17, 4   ;;  %s1016_s12 = smov %s792_s13 }
 0x2a3   : > { %s1017_s13 = smov %s796_s14  ;;  %s1018_s14 = smov %s1015_s24 }
 0x2a4   : > { %s1019_s15 = smov %s804_s16  ;;  %s1020_s16 = smov %s1022_s6 }
 0x2a5   :  { %16 = sbr.rel (!%p14_p12) target bundleno = 5 (0x5), region = 80 }
 0x2aa   :  { %493 = vsyncpa [#allocation3], 1 }
 0x2ab   :  { %495 = vsyncpa [#allocation3 + $0x1], 1 }
 0x2ac   :  { %496 = vsyncpa [#allocation5], 1 }

</bundles_post_ra>
